<compile_context>
chip_gen: v6e
topology: v6e:2x2x1
jax: 0.10.0
libtpu: 0.0.40
codegen_flags: <defaults>
</compile_context>

<pallas_src>
import numpy as np
import jax
import jax.numpy as jnp
from jax.experimental import pallas as pl
from jax.experimental.pallas import tpu as pltpu


# --------------------------------------------------------------------------
# Kernel
# --------------------------------------------------------------------------
def _double_conv_kernel(x_ref, m1_ref, s1_ref, b1_ref, m2_ref, s2_ref, b2_ref,
                        o_ref, xpad_ref, ypad_ref):
    H = o_ref.shape[1]

    # Zero the H-padded scratches (W padding is folded into the Toeplitz
    # weight matrices, so only the top/bottom rows need explicit zeros).
    xpad_ref[...] = jnp.zeros_like(xpad_ref)
    ypad_ref[...] = jnp.zeros_like(ypad_ref)
    xpad_ref[1:H + 1, :] = x_ref[0]

    # ---- conv1 (3x3 SAME) + folded BN + ReLU ------------------------------
    acc1 = jnp.zeros((H, m1_ref.shape[-1]), jnp.float32)
    for kh in range(3):                        # static unroll: 3 MXU matmuls
        acc1 += jnp.dot(xpad_ref[kh:kh + H, :], m1_ref[kh],
                        preferred_element_type=jnp.float32)
    y = jnp.maximum(acc1 * s1_ref[...] + b1_ref[...], 0.0)
    ypad_ref[1:H + 1, :] = y

    # ---- conv2 (3x3 SAME) + folded BN + ReLU ------------------------------
    acc2 = jnp.zeros((H, m2_ref.shape[-1]), jnp.float32)
    for kh in range(3):
        acc2 += jnp.dot(ypad_ref[kh:kh + H, :], m2_ref[kh],
                        preferred_element_type=jnp.float32)
    o_ref[0] = jnp.maximum(acc2 * s2_ref[...] + b2_ref[...],
                           0.0).astype(o_ref.dtype)


# --------------------------------------------------------------------------
# One-time parameter preparation (hoisted out of the per-call path)
# --------------------------------------------------------------------------
def _build_row_toeplitz(w_oihw, img_w):
    """Fold horizontal taps + W zero-padding of a 3x3 conv into three
    (img_w*Cin, img_w*Cout) block-Toeplitz matrices (one per kernel row)."""
    cout, cin, kh_sz, kw_sz = w_oihw.shape
    w = np.transpose(np.asarray(w_oihw, np.float32), (2, 3, 1, 0))  # kh,kw,ci,co
    m = np.zeros((kh_sz, img_w * cin, img_w * cout), np.float32)
    for kh in range(kh_sz):
        for kw in range(kw_sz):
            for wo in range(img_w):
                wi = wo + kw - 1                       # input column (SAME)
                if 0 <= wi < img_w:
                    m[kh, wi * cin:(wi + 1) * cin,
                      wo * cout:(wo + 1) * cout] = w[kh, kw]
    return m


def _fold_bn(conv_b, gamma, beta, mean, var, eps, img_w):
    scale = np.asarray(gamma, np.float32) / np.sqrt(
        np.asarray(var, np.float32) + eps)
    shift = (np.asarray(conv_b, np.float32)
             - np.asarray(mean, np.float32)) * scale + np.asarray(beta, np.float32)
    # Tile per-channel vectors into the flattened (w*Cout + co) lane layout.
    return (np.tile(scale, img_w).reshape(1, -1),
            np.tile(shift, img_w).reshape(1, -1))


def prepare_double_conv_params(params, img_w):
    eps = params['eps']
    m1 = _build_row_toeplitz(params['w1'], img_w)
    m2 = _build_row_toeplitz(params['w2'], img_w)
    s1, b1 = _fold_bn(params['b1'], params['g1'], params['beta1'],
                      params['mean1'], params['var1'], eps, img_w)
    s2, b2 = _fold_bn(params['b2'], params['g2'], params['beta2'],
                      params['mean2'], params['var2'], eps, img_w)
    return {k: jnp.asarray(v) for k, v in
            dict(m1=m1, s1=s1, b1=b1, m2=m2, s2=s2, b2=b2).items()}


# --------------------------------------------------------------------------
# Wrapper
# --------------------------------------------------------------------------
def double_conv(x_nchw, prep):
    B, cin, H, img_w = x_nchw.shape
    wc_in = img_w * cin
    wc_out = prep['m1'].shape[-1]
    cout = wc_out // img_w

    # NCHW -> NHWC -> (B, H, W*Cin): channels land on the lane axis.
    x_flat = jnp.transpose(x_nchw, (0, 2, 3, 1)).reshape(B, H, wc_in)

    out_flat = pl.pallas_call(
        _double_conv_kernel,
        out_shape=jax.ShapeDtypeStruct((B, H, wc_out), x_nchw.dtype),
        grid_spec=pltpu.PrefetchScalarGridSpec(
            num_scalar_prefetch=0,
            grid=(B,),
            in_specs=[
                pl.BlockSpec((1, H, wc_in), lambda b: (b, 0, 0)),       # x (streamed)
                pl.BlockSpec((3, wc_in, wc_out), lambda b: (0, 0, 0)),  # M1 (resident)
                pl.BlockSpec((1, wc_out), lambda b: (0, 0)),            # scale1
                pl.BlockSpec((1, wc_out), lambda b: (0, 0)),            # shift1
                pl.BlockSpec((3, wc_out, wc_out), lambda b: (0, 0, 0)),  # M2 (resident)
                pl.BlockSpec((1, wc_out), lambda b: (0, 0)),            # scale2
                pl.BlockSpec((1, wc_out), lambda b: (0, 0)),            # shift2
            ],
            out_specs=pl.BlockSpec((1, H, wc_out), lambda b: (b, 0, 0)),
            scratch_shapes=[
                pltpu.VMEM((H + 2, wc_in), jnp.float32),   # H-padded input
                pltpu.VMEM((H + 2, wc_out), jnp.float32),  # H-padded conv1 act
            ],
        ),
        compiler_params=pltpu.CompilerParams(
            dimension_semantics=("parallel",),      # v7x: shard batch over 2 TCs
            vmem_limit_bytes=16 * 1024 * 1024,      # tiles + headroom; safe v5e/v6e/v7x
        ),
    )(x_flat, prep['m1'], prep['s1'], prep['b1'],
      prep['m2'], prep['s2'], prep['b2'])

    # (B, H, W*Cout) -> NCHW to match the PyTorch module.
    return jnp.transpose(out_flat.reshape(B, H, img_w, cout), (0, 3, 1, 2))


# --------------------------------------------------------------------------
# Pure-JAX reference (inference-mode BN), matching the PyTorch forward
# --------------------------------------------------------------------------
def double_conv_ref(x_nchw, params):
    eps = params['eps']
    x = jnp.transpose(x_nchw, (0, 2, 3, 1))          # NHWC

    def conv_bn_relu(x, w, b, g, beta, mean, var):
        w_hwio = jnp.transpose(w, (2, 3, 1, 0))
        y = jax.lax.conv_general_dilated(
            x, w_hwio, window_strides=(1, 1), padding='SAME',
            dimension_numbers=('NHWC', 'HWIO', 'NHWC'),
            precision=jax.lax.Precision.HIGHEST) + b
        y = (y - mean) * (g / jnp.sqrt(var + eps)) + beta
        return jnp.maximum(y, 0.0)

    y = conv_bn_relu(x, params['w1'], params['b1'], params['g1'],
                     params['beta1'], params['mean1'], params['var1'])
    y = conv_bn_relu(y, params['w2'], params['b2'], params['g2'],
                     params['beta2'], params['mean2'], params['var2'])
    return jnp.transpose(y, (0, 3, 1, 2))


if __name__ == "__main__":
    B, CIN, COUT, H, W_IMG = 2, 4, 8, 16, 16          # W_IMG*COUT = 128 lanes
    keys = jax.random.split(jax.random.PRNGKey(0), 13)

    kb1 = 1.0 / np.sqrt(CIN * 9)
    kb2 = 1.0 / np.sqrt(COUT * 9)
    params = dict(
        w1=jax.random.uniform(keys[0], (COUT, CIN, 3, 3), minval=-kb1, maxval=kb1),
        b1=jax.random.uniform(keys[1], (COUT,), minval=-kb1, maxval=kb1),
        g1=jax.random.uniform(keys[2], (COUT,), minval=0.5, maxval=1.5),
        beta1=jax.random.normal(keys[3], (COUT,)) * 0.1,
        mean1=jax.random.normal(keys[4], (COUT,)) * 0.1,
        var1=jax.random.uniform(keys[5], (COUT,), minval=0.5, maxval=1.5),
        w2=jax.random.uniform(keys[6], (COUT, COUT, 3, 3), minval=-kb2, maxval=kb2),
        b2=jax.random.uniform(keys[7], (COUT,), minval=-kb2, maxval=kb2),
        g2=jax.random.uniform(keys[8], (COUT,), minval=0.5, maxval=1.5),
        beta2=jax.random.normal(keys[9], (COUT,)) * 0.1,
        mean2=jax.random.normal(keys[10], (COUT,)) * 0.1,
        var2=jax.random.uniform(keys[11], (COUT,), minval=0.5, maxval=1.5),
        eps=1e-5,
    )
    x = jax.random.normal(keys[12], (B, CIN, H, W_IMG), dtype=jnp.float32)

    prep = prepare_double_conv_params(params, W_IMG)   # one-time weight prep
    out = double_conv(x, prep)
    out = jax.block_until_ready(out)

    ref = double_conv_ref(x, params)
    assert out.shape == (B, COUT, H, W_IMG)
    max_err = float(jnp.max(jnp.abs(out - ref)))
    # Tolerance covers MXU f32-matmul vs HIGHEST-precision XLA conv differences.
    assert jnp.allclose(out, ref, atol=1e-2, rtol=1e-2), f"max abs err {max_err}"

    print("KERNEL_OK")
</pallas_src>

<mosaic_0001>
module attributes {stable_mosaic.version = 11 : i64} {
  func.func @_double_conv_kernel(%arg0: i32, %arg1: memref<1x16x64xf32, #tpu.memory_space<vmem>>, %arg2: memref<3x64x128xf32, #tpu.memory_space<vmem>>, %arg3: memref<1x128xf32, #tpu.memory_space<vmem>>, %arg4: memref<1x128xf32, #tpu.memory_space<vmem>>, %arg5: memref<3x128x128xf32, #tpu.memory_space<vmem>>, %arg6: memref<1x128xf32, #tpu.memory_space<vmem>>, %arg7: memref<1x128xf32, #tpu.memory_space<vmem>>, %arg8: memref<1x16x128xf32, #tpu.memory_space<vmem>>, %arg9: memref<18x64xf32, #tpu.memory_space<vmem>>, %arg10: memref<18x128xf32, #tpu.memory_space<vmem>>) attributes {dimension_semantics = [#tpu.dimension_semantics<parallel>], iteration_bounds = array<i64: 2>, scalar_prefetch = 0 : i64, scratch_operands = 2 : i64, tpu.core_type = #tpu.core_type<tc>, window_params = [{transform_indices = @transform_0, window_bounds = array<i64: 1, 16, 64>}, {pipeline_mode = #tpu.pipeline_mode<synchronous>, transform_indices = @transform_1, window_bounds = array<i64: 3, 64, 128>}, {pipeline_mode = #tpu.pipeline_mode<synchronous>, transform_indices = @transform_2, window_bounds = array<i64: 1, 128>}, {pipeline_mode = #tpu.pipeline_mode<synchronous>, transform_indices = @transform_3, window_bounds = array<i64: 1, 128>}, {pipeline_mode = #tpu.pipeline_mode<synchronous>, transform_indices = @transform_4, window_bounds = array<i64: 3, 128, 128>}, {pipeline_mode = #tpu.pipeline_mode<synchronous>, transform_indices = @transform_5, window_bounds = array<i64: 1, 128>}, {pipeline_mode = #tpu.pipeline_mode<synchronous>, transform_indices = @transform_6, window_bounds = array<i64: 1, 128>}, {transform_indices = @transform_7, window_bounds = array<i64: 1, 16, 128>}]} {
    %cst = arith.constant 0.000000e+00 : f32
    %0 = vector.broadcast %cst : f32 to vector<18x64xf32>
    %c0 = arith.constant 0 : index
    %c0_0 = arith.constant 0 : index
    %1 = vector.load %arg9[%c0, %c0_0] : memref<18x64xf32, #tpu.memory_space<vmem>>, vector<18x64xf32>
    tpu.vector_store %arg9[%c0, %c0_0], %0 {strides = array<i32>} : memref<18x64xf32, #tpu.memory_space<vmem>>, vector<18x64xf32>,
    %cst_1 = arith.constant 0.000000e+00 : f32
    %2 = vector.broadcast %cst_1 : f32 to vector<18x128xf32>
    %c0_2 = arith.constant 0 : index
    %c0_3 = arith.constant 0 : index
    %3 = vector.load %arg10[%c0_2, %c0_3] : memref<18x128xf32, #tpu.memory_space<vmem>>, vector<18x128xf32>
    tpu.vector_store %arg10[%c0_2, %c0_3], %2 {strides = array<i32>} : memref<18x128xf32, #tpu.memory_space<vmem>>, vector<18x128xf32>,
    %c0_4 = arith.constant 0 : index
    %c0_5 = arith.constant 0 : index
    %c0_6 = arith.constant 0 : index
    %4 = vector.load %arg1[%c0_4, %c0_5, %c0_6] : memref<1x16x64xf32, #tpu.memory_space<vmem>>, vector<1x16x64xf32>
    %5 = vector.shape_cast %4 : vector<1x16x64xf32> to vector<16x64xf32>
    %c1 = arith.constant 1 : index
    %c0_7 = arith.constant 0 : index
    %6 = vector.load %arg9[%c1, %c0_7] : memref<18x64xf32, #tpu.memory_space<vmem>>, vector<16x64xf32>
    tpu.vector_store %arg9[%c1, %c0_7], %5 {strides = array<i32>} : memref<18x64xf32, #tpu.memory_space<vmem>>, vector<16x64xf32>,
    %cst_8 = arith.constant 0.000000e+00 : f32
    %7 = vector.broadcast %cst_8 : f32 to vector<16x128xf32>
    %c0_9 = arith.constant 0 : index
    %c0_10 = arith.constant 0 : index
    %8 = vector.load %arg9[%c0_9, %c0_10] : memref<18x64xf32, #tpu.memory_space<vmem>>, vector<16x64xf32>
    %c0_11 = arith.constant 0 : index
    %c0_12 = arith.constant 0 : index
    %c0_13 = arith.constant 0 : index
    %9 = vector.load %arg2[%c0_11, %c0_12, %c0_13] : memref<3x64x128xf32, #tpu.memory_space<vmem>>, vector<1x64x128xf32>
    %10 = vector.shape_cast %9 : vector<1x64x128xf32> to vector<64x128xf32>
    %cst_14 = arith.constant dense<0.000000e+00> : vector<16x128xf32>
    %11 = tpu.matmul %8, %10, %cst_14 {dimension_numbers = #tpu.dot_dimension_numbers<[1], [0], [0], [1], [0, 0, 1, 1], [], []>} : vector<16x64xf32>, vector<64x128xf32>, vector<16x128xf32> -> vector<16x128xf32>
    %12 = arith.addf %7, %11 : vector<16x128xf32>
    %c1_15 = arith.constant 1 : index
    %c0_16 = arith.constant 0 : index
    %13 = vector.load %arg9[%c1_15, %c0_16] : memref<18x64xf32, #tpu.memory_space<vmem>>, vector<16x64xf32>
    %c1_17 = arith.constant 1 : index
    %c0_18 = arith.constant 0 : index
    %c0_19 = arith.constant 0 : index
    %14 = vector.load %arg2[%c1_17, %c0_18, %c0_19] : memref<3x64x128xf32, #tpu.memory_space<vmem>>, vector<1x64x128xf32>
    %15 = vector.shape_cast %14 : vector<1x64x128xf32> to vector<64x128xf32>
    %cst_20 = arith.constant dense<0.000000e+00> : vector<16x128xf32>
    %16 = tpu.matmul %13, %15, %cst_20 {dimension_numbers = #tpu.dot_dimension_numbers<[1], [0], [0], [1], [0, 0, 1, 1], [], []>} : vector<16x64xf32>, vector<64x128xf32>, vector<16x128xf32> -> vector<16x128xf32>
    %17 = arith.addf %12, %16 : vector<16x128xf32>
    %c2 = arith.constant 2 : index
    %c0_21 = arith.constant 0 : index
    %18 = vector.load %arg9[%c2, %c0_21] : memref<18x64xf32, #tpu.memory_space<vmem>>, vector<16x64xf32>
    %c2_22 = arith.constant 2 : index
    %c0_23 = arith.constant 0 : index
    %c0_24 = arith.constant 0 : index
    %19 = vector.load %arg2[%c2_22, %c0_23, %c0_24] : memref<3x64x128xf32, #tpu.memory_space<vmem>>, vector<1x64x128xf32>
    %20 = vector.shape_cast %19 : vector<1x64x128xf32> to vector<64x128xf32>
    %cst_25 = arith.constant dense<0.000000e+00> : vector<16x128xf32>
    %21 = tpu.matmul %18, %20, %cst_25 {dimension_numbers = #tpu.dot_dimension_numbers<[1], [0], [0], [1], [0, 0, 1, 1], [], []>} : vector<16x64xf32>, vector<64x128xf32>, vector<16x128xf32> -> vector<16x128xf32>
    %22 = arith.addf %17, %21 : vector<16x128xf32>
    %c0_26 = arith.constant 0 : index
    %c0_27 = arith.constant 0 : index
    %23 = vector.load %arg3[%c0_26, %c0_27] : memref<1x128xf32, #tpu.memory_space<vmem>>, vector<1x128xf32>
    %24 = vector.broadcast %23 : vector<1x128xf32> to vector<16x128xf32>
    %25 = arith.mulf %22, %24 : vector<16x128xf32>
    %c0_28 = arith.constant 0 : index
    %c0_29 = arith.constant 0 : index
    %26 = vector.load %arg4[%c0_28, %c0_29] : memref<1x128xf32, #tpu.memory_space<vmem>>, vector<1x128xf32>
    %27 = vector.broadcast %26 : vector<1x128xf32> to vector<16x128xf32>
    %28 = arith.addf %25, %27 : vector<16x128xf32>
    %cst_30 = arith.constant 0.000000e+00 : f32
    %29 = vector.broadcast %cst_30 : f32 to vector<16x128xf32>
    %30 = arith.maximumf %28, %29 : vector<16x128xf32>
    %c1_31 = arith.constant 1 : index
    %c0_32 = arith.constant 0 : index
    %31 = vector.load %arg10[%c1_31, %c0_32] : memref<18x128xf32, #tpu.memory_space<vmem>>, vector<16x128xf32>
    tpu.vector_store %arg10[%c1_31, %c0_32], %30 {strides = array<i32>} : memref<18x128xf32, #tpu.memory_space<vmem>>, vector<16x128xf32>,
    %cst_33 = arith.constant 0.000000e+00 : f32
    %32 = vector.broadcast %cst_33 : f32 to vector<16x128xf32>
    %c0_34 = arith.constant 0 : index
    %c0_35 = arith.constant 0 : index
    %33 = vector.load %arg10[%c0_34, %c0_35] : memref<18x128xf32, #tpu.memory_space<vmem>>, vector<16x128xf32>
    %c0_36 = arith.constant 0 : index
    %c0_37 = arith.constant 0 : index
    %c0_38 = arith.constant 0 : index
    %34 = vector.load %arg5[%c0_36, %c0_37, %c0_38] : memref<3x128x128xf32, #tpu.memory_space<vmem>>, vector<1x128x128xf32>
    %35 = vector.shape_cast %34 : vector<1x128x128xf32> to vector<128x128xf32>
    %cst_39 = arith.constant dense<0.000000e+00> : vector<16x128xf32>
    %36 = tpu.matmul %33, %35, %cst_39 {dimension_numbers = #tpu.dot_dimension_numbers<[1], [0], [0], [1], [0, 0, 1, 1], [], []>} : vector<16x128xf32>, vector<128x128xf32>, vector<16x128xf32> -> vector<16x128xf32>
    %37 = arith.addf %32, %36 : vector<16x128xf32>
    %c1_40 = arith.constant 1 : index
    %c0_41 = arith.constant 0 : index
    %38 = vector.load %arg10[%c1_40, %c0_41] : memref<18x128xf32, #tpu.memory_space<vmem>>, vector<16x128xf32>
    %c1_42 = arith.constant 1 : index
    %c0_43 = arith.constant 0 : index
    %c0_44 = arith.constant 0 : index
    %39 = vector.load %arg5[%c1_42, %c0_43, %c0_44] : memref<3x128x128xf32, #tpu.memory_space<vmem>>, vector<1x128x128xf32>
    %40 = vector.shape_cast %39 : vector<1x128x128xf32> to vector<128x128xf32>
    %cst_45 = arith.constant dense<0.000000e+00> : vector<16x128xf32>
    %41 = tpu.matmul %38, %40, %cst_45 {dimension_numbers = #tpu.dot_dimension_numbers<[1], [0], [0], [1], [0, 0, 1, 1], [], []>} : vector<16x128xf32>, vector<128x128xf32>, vector<16x128xf32> -> vector<16x128xf32>
    %42 = arith.addf %37, %41 : vector<16x128xf32>
    %c2_46 = arith.constant 2 : index
    %c0_47 = arith.constant 0 : index
    %43 = vector.load %arg10[%c2_46, %c0_47] : memref<18x128xf32, #tpu.memory_space<vmem>>, vector<16x128xf32>
    %c2_48 = arith.constant 2 : index
    %c0_49 = arith.constant 0 : index
    %c0_50 = arith.constant 0 : index
    %44 = vector.load %arg5[%c2_48, %c0_49, %c0_50] : memref<3x128x128xf32, #tpu.memory_space<vmem>>, vector<1x128x128xf32>
    %45 = vector.shape_cast %44 : vector<1x128x128xf32> to vector<128x128xf32>
    %cst_51 = arith.constant dense<0.000000e+00> : vector<16x128xf32>
    %46 = tpu.matmul %43, %45, %cst_51 {dimension_numbers = #tpu.dot_dimension_numbers<[1], [0], [0], [1], [0, 0, 1, 1], [], []>} : vector<16x128xf32>, vector<128x128xf32>, vector<16x128xf32> -> vector<16x128xf32>
    %47 = arith.addf %42, %46 : vector<16x128xf32>
    %c0_52 = arith.constant 0 : index
    %c0_53 = arith.constant 0 : index
    %48 = vector.load %arg6[%c0_52, %c0_53] : memref<1x128xf32, #tpu.memory_space<vmem>>, vector<1x128xf32>
    %49 = vector.broadcast %48 : vector<1x128xf32> to vector<16x128xf32>
    %50 = arith.mulf %47, %49 : vector<16x128xf32>
    %c0_54 = arith.constant 0 : index
    %c0_55 = arith.constant 0 : index
    %51 = vector.load %arg7[%c0_54, %c0_55] : memref<1x128xf32, #tpu.memory_space<vmem>>, vector<1x128xf32>
    %52 = vector.broadcast %51 : vector<1x128xf32> to vector<16x128xf32>
    %53 = arith.addf %50, %52 : vector<16x128xf32>
    %cst_56 = arith.constant 0.000000e+00 : f32
    %54 = vector.broadcast %cst_56 : f32 to vector<16x128xf32>
    %55 = arith.maximumf %53, %54 : vector<16x128xf32>
    %c0_57 = arith.constant 0 : index
    %c0_58 = arith.constant 0 : index
    %c0_59 = arith.constant 0 : index
    %56 = vector.load %arg8[%c0_57, %c0_58, %c0_59] : memref<1x16x128xf32, #tpu.memory_space<vmem>>, vector<1x16x128xf32>
    %57 = vector.shape_cast %56 : vector<1x16x128xf32> to vector<16x128xf32>
    %58 = vector.shape_cast %55 : vector<16x128xf32> to vector<1x16x128xf32>
    tpu.vector_store %arg8[%c0_57, %c0_58, %c0_59], %58 {strides = array<i32>} : memref<1x16x128xf32, #tpu.memory_space<vmem>>, vector<1x16x128xf32>,
    return
  }
  func.func @transform_0(%arg0: i32) -> (i32, i32, i32) {
    %c0_i32 = arith.constant 0 : i32
    %c0_i32_0 = arith.constant 0 : i32
    %c0_i32_1 = arith.constant 0 : i32
    return %arg0, %c0_i32, %c0_i32_0 : i32, i32, i32
  }
  func.func @transform_1(%arg0: i32) -> (i32, i32, i32) {
    %c0_i32 = arith.constant 0 : i32
    %c0_i32_0 = arith.constant 0 : i32
    %c0_i32_1 = arith.constant 0 : i32
    %c0_i32_2 = arith.constant 0 : i32
    return %c0_i32, %c0_i32_0, %c0_i32_1 : i32, i32, i32
  }
  func.func @transform_2(%arg0: i32) -> (i32, i32) {
    %c0_i32 = arith.constant 0 : i32
    %c0_i32_0 = arith.constant 0 : i32
    %c0_i32_1 = arith.constant 0 : i32
    return %c0_i32, %c0_i32_0 : i32, i32
  }
  func.func @transform_3(%arg0: i32) -> (i32, i32) {
    %c0_i32 = arith.constant 0 : i32
    %c0_i32_0 = arith.constant 0 : i32
    %c0_i32_1 = arith.constant 0 : i32
    return %c0_i32, %c0_i32_0 : i32, i32
  }
  func.func @transform_4(%arg0: i32) -> (i32, i32, i32) {
    %c0_i32 = arith.constant 0 : i32
    %c0_i32_0 = arith.constant 0 : i32
    %c0_i32_1 = arith.constant 0 : i32
    %c0_i32_2 = arith.constant 0 : i32
    return %c0_i32, %c0_i32_0, %c0_i32_1 : i32, i32, i32
  }
  func.func @transform_5(%arg0: i32) -> (i32, i32) {
    %c0_i32 = arith.constant 0 : i32
    %c0_i32_0 = arith.constant 0 : i32
    %c0_i32_1 = arith.constant 0 : i32
    return %c0_i32, %c0_i32_0 : i32, i32
  }
  func.func @transform_6(%arg0: i32) -> (i32, i32) {
    %c0_i32 = arith.constant 0 : i32
    %c0_i32_0 = arith.constant 0 : i32
    %c0_i32_1 = arith.constant 0 : i32
    return %c0_i32, %c0_i32_0 : i32, i32
  }
  func.func @transform_7(%arg0: i32) -> (i32, i32, i32) {
    %c0_i32 = arith.constant 0 : i32
    %c0_i32_0 = arith.constant 0 : i32
    %c0_i32_1 = arith.constant 0 : i32
    return %arg0, %c0_i32, %c0_i32_0 : i32, i32, i32
  }
}

</mosaic_0001>

<bundles_post_ra>
// kernel: tpu_custom_call.1
= control target key start
LH: loop header
LB: loop body
LE: loop exit
PB: predicated region body
PF: predicated region fallthrough
CT: control target
= control target key end

     0   :  { %s1822_s0 = inlined_call_operand.hbm [shape: f32[2,16,64], index: 0, kind: input, shape index: {}]   ;;  %s1823_s1 = inlined_call_operand.hbm [shape: f32[3,64,128], index: 1, kind: input, shape index: {}]   ;;  %s1824_s2 = inlined_call_operand.vmem [shape: f32[1,128], index: 2, kind: input, shape index: {}]   ;;  %s1825_s3 = inlined_call_operand.vmem [shape: f32[1,128], index: 3, kind: input, shape index: {}]   ;;  %s1826_s4 = inlined_call_operand.hbm [shape: f32[3,128,128], index: 4, kind: input, shape index: {}]   ;;  %s1827_s5 = inlined_call_operand.vmem [shape: f32[1,128], index: 5, kind: input, shape index: {}]   ;;  %s1828_s6 = inlined_call_operand.vmem [shape: f32[1,128], index: 6, kind: input, shape index: {}]   ;;  %s1829_s7 = inlined_call_operand.hbm [shape: f32[2,16,128], index: 7, kind: output, shape index: {}]  }
   0x1   :  { %1836 = sst [smem:[#allocation14_spill]] %s1823_s1 }
   0x2   :  { %12 = vsyncpa [#allocation5], 0 }
   0x3   :  { %14 = vsyncpa [#allocation5 + $0x1], 0 }
   0x4   :  { %15 = vsyncpa [#allocation8], 0 }
   0x5   :  { %16 = vsyncpa [#allocation6], 0 }
   0x6   :  { %18 = vsyncpa [#allocation6 + $0x1], 0  ;;  %s1595_s24 = smov 0   ;;  %s1597_s25 = smov 0  }
   0x7   :  { %s1599_s26 = smov 0   ;;  %s1601_s27 = smov 0  }
   0x8 LB: > { %s1616_s28 = sadd.s32 4294967295, %s1544_s27   ;;  %s1048_s29 = sadd.s32 4294967294, %s1544_s27   ;;  %s1544_s27 = sphi %s1601_s27, %s1856_s27   ;;  %s1540_s26 = sphi %s1599_s26, %s1855_s26   ;;  %s1536_s25 = sphi %s1597_s25, %s1854_s25   ;;  %s1532_s24 = sphi %s1595_s24, %s1853_s24  }
   0x9   : > { %p44_p0 = scmp.ne.s32.totalorder %s1536_s25, %s1532_s24  ;;  %p1831_p1 = scmp.eq.s32.totalorder %s1616_s28, 0 }
   0xa   : > { %p194_p2 = scmp.eq.s32.totalorder %s1616_s28, 1  ;;  %p200_p3 = scmp.eq.s32.totalorder %s1048_s29, 1 }
   0xb   : > { %p1625_p4 = por %p1831_p1, %p44_p0  ;;  %p1049_p5 = scmp.ge.s32.totalorder %s1544_s27, 1 }
   0xc   : > { %p1630_p6 = por %p200_p3, %p44_p0  ;;  %p207_p7 = scmp.lt.s32.totalorder %s1544_s27, 3 }
   0xd   : > { %s1837_s30 = scalar_select %p1625_p4, 1, 0 }
   0xe   : > { %s1838_s8 = scalar_select %p1630_p6, 1, 0 }
   0xf   : > { %p1635_p8 = pnand %p1049_p5, %p207_p7  ;;  %s1546_s10 = smov [#allocation7]  }
  0x10   : > { %s219_s11 = sshll.u32 %s1546_s10, 4  ;;  %s1547_s13 = smov [#allocation9]   ;;  %s220_s11 = int_to_ptr.vmem [resolvable:$true] %s219_s11 }
  0x11   : > { %s1839_s9 = scalar_select %p1635_p8, 1, 0 }
  0x12   : > { %p1336_p9 = pneg %p1635_p8  ;;  %s238_s14 = sshll.u32 %s1547_s13, 4  ;;  %s239_s14 = int_to_ptr.vmem [resolvable:$true] %s238_s14 }
  0x13   : > { %s1407_s15 = scalar_lea.vmem %s220_s11, 3072  ;;  %p1415_p5 = scmp.lt.s32.totalorder %s220_s11, %s220_s11 }
  0x14   : > { %p1644_p11 = pnand %p1336_p9, %p1831_p1  ;;  %p1408_p13 = scmp.ne.s32.totalorder %s220_s11, %s1407_s15 }
  0x15   : > { %p1416_p7 = scmp.lt.s32.totalorder %s1407_s15, %s1407_s15 }
  0x16   : > { %p1398_p12 = pneg %p1644_p11 }
  0x17   : > { %p1417_p10 = por %p1416_p7, %p1415_p5 }
  0x18   : > { %p1410_p0 = pnand %p1408_p13, %p1398_p12 }
  0x1a   : > { %p1411_p3 = pneg %p1410_p0 }
  0x1c   : > { %p1418_p9 = pnand %p1417_p10, %p1411_p3 }
  0x1e   : > { %1421 = shalt.err (!%p1418_p9)
}
  0x1f   : > { %s1830_s16 = smov 128   ;;  %s1832_s17 = smov 8  }
  0x20   : > { %s1841_s1 = sld [smem:[#allocation14_spill]]  ;;  %s1433_s20 = scalar_lea.vmem %s239_s14, 6144 }
  0x21   : > { %p1434_p13 = scmp.ne.s32.totalorder %s239_s14, %s1433_s20  ;;  %p1441_p10 = scmp.lt.s32.totalorder %s239_s14, %s239_s14 }
  0x22   : > { %p1442_p3 = scmp.lt.s32.totalorder %s1433_s20, %s1433_s20 }
  0x23   : > { %p1436_p0 = pnand %p1434_p13, %p1398_p12 }
  0x24   : > { %p1443_p7 = por %p1442_p3, %p1441_p10 }
  0x25   : > { %p1437_p5 = pneg %p1436_p0 }
  0x26   : > { %1339 = dma.hbm_to_vmem [thread:$0]  (!%p1644_p11), %s1841_s1, 3072, %s220_s11, [#allocation8], %s1830_s16, %s1830_s16, %s1832_s17  }
  0x27   : > { %p1444_p9 = pnand %p1443_p7, %p1437_p5 }
  0x29   : > { %1447 = shalt.err (!%p1444_p9)
}
  0x2a   : > { %1342 = dma.hbm_to_vmem [thread:$0]  (!%p1644_p11), %s1826_s4, 6144, %s239_s14, [#allocation8], %s1830_s16, %s1830_s16, %s1832_s17  }
  0x2b   : > { %s1673_s23 = sadd.s32 1, %s1544_s27   ;;  %s31_s29 = sadd.s32 1, %s1540_s26 }
  0x2c   : > { %s28_s10 = ssub.s32 %s1544_s27, %s1673_s23  ;;  %p38_p12 = scmp.ne.s32.totalorder %s1540_s26, %s1536_s25 }
  0x2d   : > { %p29_p13 = scmp.eq.s32.totalorder %s28_s10, 0  ;;  %p39_p0 = scmp.eq.s32.totalorder %s1544_s27, 0 }
  0x2e   : > { %p1683_p5 = por %p194_p2, %p38_p12  ;;  %p1353_p10 = scmp.lt.s32.totalorder %s1544_s27, 2 }
  0x2f   : > { %s1689_s12 = scalar_select %p29_p13, %s1540_s26, %s31_s29  }
  0x30   : > { %s1842_s11 = scalar_select %p1683_p5, 1, 0 }
  0x31   : > { %p40_p3 = por %p39_p0, %p38_p12  ;;  %s258_s13 = sand.u32 1, %s1540_s26  }
  0x32   : > { %s1053_s15 = sshll.u32 %s258_s13, 4  ;;  %s1076_s14 = sshll.u32 %s1544_s27, 8 }
  0x33   : > { %s1696_s20 = scalar_lea.hbm %s1822_s0, %s1076_s14  ;;  %s262_s21 = scalar_lea.vmem [#allocation4], %s1053_s15 }
  0x34   : > { %s269_s22 = sshll.u32 %s262_s21, 4  ;;  %p1700_p2 = pnand %p1353_p10, %p40_p3  ;;  %s1698_s22 = int_to_ptr.vmem [resolvable:$true] %s269_s22 }
  0x35   : > { %s1704_s29 = scalar_lea.sflag [#allocation5], %s258_s13  ;;  %s1448_s16 = scalar_lea.hbm %s1696_s20, 256 }
  0x36   : > { %p1449_p11 = scmp.ne.s32.totalorder %s1696_s20, %s1448_s16  ;;  %p1450_p7 = pneg %p1700_p2 }
  0x37   : > { %s1453_s15 = scalar_lea.hbm %s1822_s0, 512  ;;  %p1454_p13 = scmp.lt.s32.totalorder %s1696_s20, %s1822_s0 }
  0x38   : > { %p1451_p9 = pnand %p1450_p7, %p1449_p11  ;;  %p1455_p0 = scmp.lt.s32.totalorder %s1453_s15, %s1448_s16 }
  0x3a   : > { %p1452_p12 = pneg %p1451_p9  ;;  %p1456_p10 = por %p1455_p0, %p1454_p13 }
  0x3c   : > { %p1457_p3 = pnand %p1456_p10, %p1452_p12 }
  0x3e   : > { %1460 = shalt.err (!%p1457_p3)
}
  0x3f   : > { %s1461_s13 = scalar_lea.vmem %s1698_s22, 256  ;;  %s1550_s17 = smov [#allocation4]  }
  0x40   : > { %p1462_p1 = scmp.ne.s32.totalorder %s1698_s22, %s1461_s13  ;;  %s1466_s1 = sshll.u32 %s1550_s17, 4  ;;  %s1467_s1 = int_to_ptr.vmem [resolvable:$false] %s1466_s1 }
  0x41   : > { %s1468_s14 = scalar_lea.vmem %s1467_s1, 512  ;;  %p1469_p9 = scmp.lt.s32.totalorder %s1698_s22, %s1467_s1 }
  0x42   : > { %p1464_p6 = pnand %p1462_p1, %p1450_p7  ;;  %p1470_p5 = scmp.lt.s32.totalorder %s1468_s14, %s1461_s13 }
  0x44   : > { %p1465_p11 = pneg %p1464_p6  ;;  %p1471_p4 = por %p1470_p5, %p1469_p9 }
  0x46   : > { %p1472_p8 = pnand %p1471_p4, %p1465_p11 }
  0x48   : > { %1475 = shalt.err (!%p1472_p8)
}
  0x49   : > { %s1844_s16 = smov 8   ;;  %s1845_s18 = smov 128  }
  0x4a   : > { %1346 = dma.hbm_to_vmem [thread:$0]  (!%p1700_p2), %s1696_s20, 256, %s1698_s22, %s1704_s29, %s1845_s18, %s1845_s18, %s1844_s16  }
  0x4b   : > { %p1846_p1 = scmp.ne.s32.totalorder %s1839_s9, 0 }
  0x4c   : > { %s1731_s17 = sand.u32 (!%p1846_p1), 1, %s1536_s25   ;;  %p1847_p4 = scmp.ne.s32.totalorder (!%p1846_p1), %s1837_s30, 0 }
  0x4d   : > { %281 = sbr.rel (%p1846_p1) target bundleno = 575 (0x23f), region = 48  ;;  %s1057_s1 = sshll.u32 (!%p1846_p1), %s1731_s17, 4 }
  0x4e   : > { %s284_s15 = scalar_lea.sflag (!%p1846_p1), [#allocation5], %s1731_s17  ;;  %s1737_s10 = scalar_lea.vmem (!%p1846_p1), [#allocation4], %s1057_s1 }
  0x52   : > { %1519 = dma.done.wait (%p1847_p4), %s284_s15, 256  }
  0x53   : > { %1521 = vsyncadd (%p1847_p4), %s284_s15, 4294967040  ;;  %p1848_p6 = scmp.eq.s32.totalorder %s1616_s28, 0 }
  0x55   : > { %1523 = dma.done.wait (%p1848_p6), [#allocation8], 9216   ;;  %p1849_p8 = pmov %p1848_p6 }
  0x56   : > { %vm326_vm0 = vcmask 523264   ;;  %vm329_vm1 = vcmask 517120   ;;  %v1551_v0 = vmov 0.0   ;;  %v358_v1 = vld [vmem:[#allocation7 + $0x78] sm:$0xff]  ;;  %v357_v3 = vld [vmem:[#allocation7 + $0x70] sm:$0xff]  ;;  %v356_v5 = vld [vmem:[#allocation7 + $0x68] sm:$0xff] }
  0x57   : > { %1525 = vsyncadd (%p1849_p8), [#allocation8], 4294958080  ;;  %327 = vst.msk [vmem:[#allocation2] sm:$0xff] %vm326_vm0, %v1551_v0  ;;  %v347_v2 = vld [vmem:[#allocation7 + $0x38] sm:$0xff]  ;;  %1162 = vmatprep.subr.mxu0 %v358_v1  ;;  %v346_v4 = vld [vmem:[#allocation7 + $0x30] sm:$0xff]  ;;  %s325_s14 = scalar_lea.vmem [#allocation10], %s1057_s1 }
  0x58   : > { %328 = vst.msk [vmem:[#allocation2 + $0x8] sm:$0xff] %vm326_vm0, %v1551_v0  ;;  %331 = vst [vmem:[#allocation3] sm:$0xff] %v1551_v0  ;;  %1181 = vmatprep.subr.mxu1 %v347_v2  ;;  %1163 = vmatpush3.msra.mxu0 %v358_v1  ;;  %v345_v6 = vld [vmem:[#allocation7 + $0x28] sm:$0xff]  ;;  %v355_v7 = vld [vmem:[#allocation7 + $0x60] sm:$0xff]  ;;  %s956_s16 = sshll.u32 %s325_s14, 4  ;;  %s1077_s18 = sshll.u32 %s1616_s28, 8  ;;  %s1774_s16 = int_to_ptr.vmem [resolvable:$true] %s956_s16 }
  0x59   : > { %332 = vst [vmem:[#allocation3 + $0x8] sm:$0xff] %v1551_v0  ;;  %333 = vst [vmem:[#allocation3 + $0x10] sm:$0x3] %v1551_v0  ;;  %1182 = vmatpush3.msra.mxu1 %v347_v2  ;;  %1164 = vmatprep.subr.mxu0 %v357_v3  ;;  %v344_v8 = vld [vmem:[#allocation7 + $0x20] sm:$0xff]  ;;  %v335_v10 = vld [vmem:[%s1737_s10 + $0x8] sm:$0xff]  ;;  %s1779_s30 = scalar_lea.hbm %s1829_s7, %s1077_s18  ;;  %s943_s1 = scalar_lea.sflag [#allocation6], %s1731_s17 }
  0x5a   : > { %330 = vst.msk [vmem:[#allocation2 + $0x10] sm:$0x3] %vm329_vm1, %v1551_v0  ;;  %1183 = vmatprep.subr.mxu1 %v346_v4  ;;  %1165 = vmatpush3.msra.mxu0 %v357_v3  ;;  %v334_v9 = vld [vmem:[%s1737_s10] sm:$0xff]  ;;  %v354_v11 = vld [vmem:[#allocation7 + $0x58] sm:$0xff]  ;;  %v352_v15 = vld [vmem:[#allocation7 + $0x48] sm:$0xff]  ;;  %s1476_s9 = scalar_lea.vmem %s1774_s16, 256 }
  0x5b   : > { %1184 = vmatpush3.msra.mxu1 %v346_v4  ;;  %1166 = vmatprep.subr.mxu0 %v356_v5  ;;  %v343_v12 = vld [vmem:[#allocation7 + $0x18] sm:$0xff]  ;;  %336 = vst.msk [vmem:[#allocation2 + $0x1] sm:$0xff] %vm326_vm0, %v334_v9  ;;  %337 = vst.msk [vmem:[#allocation2 + $0x9] sm:$0xff] %vm326_vm0, %v335_v10  ;;  %v353_v13 = vld [vmem:[#allocation7 + $0x50] sm:$0xff]  ;;  %p1477_p5 = scmp.ne.s32.totalorder %s1774_s16, %s1476_s9  ;;  %p1850_p2 = scmp.ne.s32.totalorder %s1842_s11, 0 }
  0x5c   : > { %1185 = vmatprep.subr.mxu1 %v345_v6  ;;  %1167 = vmatpush3.msra.mxu0 %v356_v5  ;;  %v342_v14 = vld [vmem:[#allocation7 + $0x10] sm:$0xff]  ;;  %v341_v16 = vld [vmem:[#allocation7 + $0x8] sm:$0xff]  ;;  %v351_v17 = vld [vmem:[#allocation7 + $0x40] sm:$0xff]  ;;  %s1552_s28 = smov [#allocation10]  }
  0x5d   : > { %1186 = vmatpush3.msra.mxu1 %v345_v6  ;;  %1168 = vmatprep.subr.mxu0 %v355_v7  ;;  %v340_v18 = vld [vmem:[#allocation7] sm:$0xff]  ;;  %v531_v23 = vld [vmem:[#allocation7 + $0xb8] sm:$0xff]  ;;  %v530_v25 = vld [vmem:[#allocation7 + $0xb0] sm:$0xff]  ;;  %p1478_p7 = pnand %p1477_p5, %p1850_p2  ;;  %s1480_s20 = sshll.u32 %s1552_s28, 4  ;;  %s1481_s20 = int_to_ptr.vmem [resolvable:$false] %s1480_s20 }
  0x5e   : > { %1187 = vmatprep.subr.mxu1 %v344_v8  ;;  %1169 = vmatpush3.msra.mxu0 %v355_v7  ;;  %v529_v26 = vld [vmem:[#allocation7 + $0xa8] sm:$0xff]  ;;  %v528_v27 = vld [vmem:[#allocation7 + $0xa0] sm:$0xff]  ;;  %v527_v28 = vld [vmem:[#allocation7 + $0x98] sm:$0xff]  ;;  %s1482_s22 = scalar_lea.vmem %s1481_s20, 512  ;;  %p1483_p13 = scmp.lt.s32.totalorder %s1774_s16, %s1481_s20 }
  0x5f   : > { %1188 = vmatpush3.msra.mxu1 %v344_v8  ;;  %1170 = vmatprep.subr.mxu0 %v354_v11  ;;  %v526_v29 = vld [vmem:[#allocation7 + $0x90] sm:$0xff]  ;;  %v525_v30 = vld [vmem:[#allocation7 + $0x88] sm:$0xff]  ;;  %v524_v31 = vld [vmem:[#allocation7 + $0x80] sm:$0xff]  ;;  %p1479_p12 = pneg %p1478_p7  ;;  %p1484_p0 = scmp.lt.s32.totalorder %s1482_s22, %s1476_s9 }
  0x60   : > { %1189 = vmatprep.subr.mxu1 %v343_v12  ;;  %1171 = vmatpush3.msra.mxu0 %v354_v11  ;;  %v673_v33 = vld [vmem:[#allocation9 + $0xf8] sm:$0xff]  ;;  %v672_v34 = vld [vmem:[#allocation9 + $0xf0] sm:$0xff]  ;;  %v671_v35 = vld [vmem:[#allocation9 + $0xe8] sm:$0xff] }
  0x61   : > { %1190 = vmatpush3.msra.mxu1 %v343_v12  ;;  %1172 = vmatprep.subr.mxu0 %v353_v13  ;;  %v670_v36 = vld [vmem:[#allocation9 + $0xe0] sm:$0xff]  ;;  %v654_v37 = vld [vmem:[#allocation9 + $0x78] sm:$0xff]  ;;  %v653_v38 = vld [vmem:[#allocation9 + $0x70] sm:$0xff]  ;;  %p1485_p10 = por %p1484_p0, %p1483_p13 }
  0x62   : > { %1191 = vmatprep.subr.mxu1 %v342_v14  ;;  %1173 = vmatpush3.msra.mxu0 %v353_v13  ;;  %v348_v19 = vld [vmem:[#allocation2 + $0x1] sm:$0xff]  ;;  %v349_v21 = vld [vmem:[#allocation2 + $0x9] sm:$0xff]  ;;  %v652_v40 = vld [vmem:[#allocation9 + $0x68] sm:$0xff] }
  0x63   : > { %1192 = vmatpush3.msra.mxu1 %v342_v14  ;;  %1174 = vmatprep.subr.mxu0 %v352_v15  ;;  %v338_v20 = vld [vmem:[#allocation2] sm:$0xff]  ;;  %v339_v22 = vld [vmem:[#allocation2 + $0x8] sm:$0xff]  ;;  %v667_v42 = vld [vmem:[#allocation9 + $0xc8] sm:$0xff]  ;;  %p1486_p3 = pnand %p1485_p10, %p1479_p12 }
  0x64   : > { %1193 = vmatprep.subr.mxu1 %v341_v16  ;;  %1175 = vmatpush3.msra.mxu0 %v352_v15  ;;  %v521_v24 = vld [vmem:[#allocation2 + $0x2] sm:$0xff]  ;;  %v522_v32 = vld [vmem:[#allocation2 + $0xa] sm:$0xff]  ;;  %v663_v49 = vld [vmem:[#allocation9 + $0xa8] sm:$0xff] }
  0x65   : > { %1194 = vmatpush3.msra.mxu1 %v341_v16  ;;  %1176 = vmatprep.subr.mxu0 %v351_v17  ;;  %v669_v39 = vld [vmem:[#allocation9 + $0xd8] sm:$0xff]  ;;  %v668_v41 = vld [vmem:[#allocation9 + $0xd0] sm:$0xff]  ;;  %v651_v43 = vld [vmem:[#allocation9 + $0x60] sm:$0xff] }
  0x66   : > { %1195 = vmatprep.subr.mxu1 %v340_v18  ;;  %1177 = vmatpush3.msra.mxu0 %v351_v17  ;;  %v650_v44 = vld [vmem:[#allocation9 + $0x58] sm:$0xff]  ;;  %v666_v45 = vld [vmem:[#allocation9 + $0xc0] sm:$0xff]  ;;  %v649_v46 = vld [vmem:[#allocation9 + $0x50] sm:$0xff] }
  0x67   : > { %1178 = vmatprep.mubr.msk.f32.mxu0 %vm326_vm0, %v348_v19  ;;  %1196 = vmatpush3.msra.mxu1 %v340_v18  ;;  %v665_v47 = vld [vmem:[#allocation9 + $0xb8] sm:$0xff]  ;;  %v664_v48 = vld [vmem:[#allocation9 + $0xb0] sm:$0xff]  ;;  %v648_v50 = vld [vmem:[#allocation9 + $0x48] sm:$0xff] }
  0x68   : > { %1197 = vmatprep.mubr.msk.f32.mxu1 %vm326_vm0, %v338_v20  ;;  %1179 = vmatmul.mubr.msk.f32.vlgmr.msra.gmra.mxu0 %vm326_vm0, %v349_v21  ;;  %v662_v51 = vld [vmem:[#allocation9 + $0xa0] sm:$0xff]  ;;  %v661_v53 = vld [vmem:[#allocation9 + $0x98] sm:$0xff]  ;;  %v660_v55 = vld [vmem:[#allocation9 + $0x90] sm:$0xff] }
  0x69   : > { %1198 = vmatmul.mubr.msk.f32.vlgmr.msra.gmra.mxu1 %vm326_vm0, %v339_v22  ;;  %1200 = vmatprep.subr.mxu0 %v531_v23  ;;  %v647_v52 = vld [vmem:[#allocation9 + $0x40] sm:$0xff]  ;;  %v646_v54 = vld [vmem:[#allocation9 + $0x38] sm:$0xff]  ;;  %v645_v56 = vld [vmem:[#allocation9 + $0x30] sm:$0xff] }
  0x6a   : > { %1216 = vmatprep.mubr.msk.f32.mxu0 %vm326_vm0, %v521_v24  ;;  %1201 = vmatpush3.msra.mxu0 %v531_v23  ;;  %v659_v57 = vld [vmem:[#allocation9 + $0x88] sm:$0xff]  ;;  %v658_v59 = vld [vmem:[#allocation9 + $0x80] sm:$0xff]  ;;  %v842_v61 = vld [vmem:[#allocation9 + $0x178] sm:$0xff] }
  0x6b   : > { %1202 = vmatprep.subr.mxu0 %v530_v25  ;;  %1219 = vmatprep.subr.mxu1 %v673_v33  ;;  %v644_v58 = vld [vmem:[#allocation9 + $0x28] sm:$0xff]  ;;  %v643_v60 = vld [vmem:[#allocation9 + $0x20] sm:$0xff]  ;;  %v642_v62 = vld [vmem:[#allocation9 + $0x18] sm:$0xff] }
  0x6c   : > { %1203 = vmatpush3.msra.mxu0 %v530_v25  ;;  %1220 = vmatpush3.msra.mxu1 %v673_v33  ;;  %v641_v63 = vld [vmem:[#allocation9 + $0x10] sm:$0xff]  ;;  %v640_v0 = vld [vmem:[#allocation9 + $0x8] sm:$0xff]  ;;  %v639_v1 = vld [vmem:[#allocation9] sm:$0xff] }
  0x6d   : > { %1204 = vmatprep.subr.mxu0 %v529_v26  ;;  %1221 = vmatprep.subr.mxu1 %v672_v34  ;;  %v1067_v8 = vld [vmem:[%s1824_s2] ss:$0 sm:$0xff]  ;;  %v840_v21 = vld [vmem:[#allocation9 + $0x168] sm:$0xff]  ;;  %v839_v22 = vld [vmem:[#allocation9 + $0x160] sm:$0xff] }
  0x6e   : > { %1205 = vmatpush3.msra.mxu0 %v529_v26  ;;  %1222 = vmatpush3.msra.mxu1 %v672_v34  ;;  %v1068_v11 = vld [vmem:[%s1825_s3] ss:$0 sm:$0xff]  ;;  %v838_v23 = vld [vmem:[#allocation9 + $0x158] sm:$0xff]  ;;  %v831_v33 = vld [vmem:[#allocation9 + $0x120] sm:$0xff] }
  0x6f   : > { %1206 = vmatprep.subr.mxu0 %v528_v27  ;;  %1223 = vmatprep.subr.mxu1 %v671_v35  ;;  %v841_v20 = vld [vmem:[#allocation9 + $0x170] sm:$0xff]  ;;  %v830_v34 = vld [vmem:[#allocation9 + $0x118] sm:$0xff] }
  0x70   : > { %1207 = vmatpush3.msra.mxu0 %v528_v27  ;;  %1224 = vmatpush3.msra.mxu1 %v671_v35  ;;  %v837_v27 = vld [vmem:[#allocation9 + $0x150] sm:$0xff] }
  0x71   : > { %1208 = vmatprep.subr.mxu0 %v527_v28  ;;  %1225 = vmatprep.subr.mxu1 %v670_v36  ;;  %v829_v35 = vld [vmem:[#allocation9 + $0x110] sm:$0xff] }
  0x72   : > { %1209 = vmatpush3.msra.mxu0 %v527_v28  ;;  %1226 = vmatpush3.msra.mxu1 %v670_v36  ;;  %v836_v28 = vld [vmem:[#allocation9 + $0x148] sm:$0xff] }
  0x73   : > { %1210 = vmatprep.subr.mxu0 %v526_v29  ;;  %1227 = vmatprep.subr.mxu1 %v669_v39  ;;  %v828_v36 = vld [vmem:[#allocation9 + $0x108] sm:$0xff] }
  0x74   : > { %1211 = vmatpush3.msra.mxu0 %v526_v29  ;;  %1228 = vmatpush3.msra.mxu1 %v669_v39  ;;  %v835_v29 = vld [vmem:[#allocation9 + $0x140] sm:$0xff] }
  0x75   : > { %1212 = vmatprep.subr.mxu0 %v525_v30  ;;  %1229 = vmatprep.subr.mxu1 %v668_v41 }
  0x76   : > { %1213 = vmatpush3.msra.mxu0 %v525_v30  ;;  %1230 = vmatpush3.msra.mxu1 %v668_v41  ;;  %v834_v30 = vld [vmem:[#allocation9 + $0x138] sm:$0xff] }
  0x77   : > { %1214 = vmatprep.subr.mxu0 %v524_v31  ;;  %1231 = vmatprep.subr.mxu1 %v667_v42 }
  0x78   : > { %1215 = vmatpush3.msra.mxu0 %v524_v31  ;;  %1232 = vmatpush3.msra.mxu1 %v667_v42  ;;  %v833_v31 = vld [vmem:[#allocation9 + $0x130] sm:$0xff] }
  0x79   : > { %1217 = vmatmul.mubr.msk.f32.vlgmr.msra.gmra.mxu0 %vm326_vm0, %v522_v32  ;;  %1254 = vmatprep.subr.mxu0 %v654_v37  ;;  %v832_v32 = vld [vmem:[#allocation9 + $0x128] sm:$0xff] }
  0x7a   : > { %1255 = vmatpush3.msra.mxu0 %v654_v37  ;;  %1233 = vmatprep.subr.mxu1 %v666_v45  ;;  %v827_v37 = vld [vmem:[#allocation9 + $0x100] sm:$0xff] }
  0x7b   : > { %1256 = vmatprep.subr.mxu0 %v653_v38  ;;  %1234 = vmatpush3.msra.mxu1 %v666_v45  ;;  %v1069_v45 = vld [vmem:[%s1827_s5] ss:$0 sm:$0xff] }
  0x7c   : > { %1257 = vmatpush3.msra.mxu0 %v653_v38  ;;  %1235 = vmatprep.subr.mxu1 %v665_v47 }
  0x7d   : > { %1258 = vmatprep.subr.mxu0 %v652_v40  ;;  %1236 = vmatpush3.msra.mxu1 %v665_v47 }
  0x7e   : > { %1259 = vmatpush3.msra.mxu0 %v652_v40  ;;  %1237 = vmatprep.subr.mxu1 %v664_v48 }
  0x7f   : > { %1260 = vmatprep.subr.mxu0 %v651_v43  ;;  %1238 = vmatpush3.msra.mxu1 %v664_v48  ;;  %v1070_v48 = vld [vmem:[%s1828_s6] ss:$0 sm:$0xff] }
  0x80   : > { %1261 = vmatpush3.msra.mxu0 %v651_v43  ;;  %1239 = vmatprep.subr.mxu1 %v663_v49 }
  0x81   : > { %1262 = vmatprep.subr.mxu0 %v650_v44  ;;  %1240 = vmatpush3.msra.mxu1 %v663_v49 }
  0x82   : > { %1263 = vmatpush3.msra.mxu0 %v650_v44  ;;  %1241 = vmatprep.subr.mxu1 %v662_v51 }
  0x83   : > { %1264 = vmatprep.subr.mxu0 %v649_v46  ;;  %1242 = vmatpush3.msra.mxu1 %v662_v51 }
  0x84   : > { %1265 = vmatpush3.msra.mxu0 %v649_v46  ;;  %1243 = vmatprep.subr.mxu1 %v661_v53 }
  0x85   : > { %1266 = vmatprep.subr.mxu0 %v648_v50  ;;  %1244 = vmatpush3.msra.mxu1 %v661_v53 }
  0x86   : > { %1267 = vmatpush3.msra.mxu0 %v648_v50  ;;  %1245 = vmatprep.subr.mxu1 %v660_v55 }
  0x87   : > { %1268 = vmatprep.subr.mxu0 %v647_v52  ;;  %1246 = vmatpush3.msra.mxu1 %v660_v55 }
  0x88   : > { %1269 = vmatpush3.msra.mxu0 %v647_v52  ;;  %1247 = vmatprep.subr.mxu1 %v659_v57 }
  0x89   : > { %1270 = vmatprep.subr.mxu0 %v646_v54  ;;  %1248 = vmatpush3.msra.mxu1 %v659_v57 }
  0x8a   : > { %1271 = vmatpush3.msra.mxu0 %v646_v54  ;;  %1249 = vmatprep.subr.mxu1 %v658_v59 }
  0x8b   : > { %1272 = vmatprep.subr.mxu0 %v645_v56  ;;  %1250 = vmatpush3.msra.mxu1 %v658_v59 }
  0x8c   : > { %1273 = vmatpush3.msra.mxu0 %v645_v56  ;;  %1289 = vmatprep.subr.mxu1 %v842_v61 }
  0x8d   : > { %1274 = vmatprep.subr.mxu0 %v644_v58 }
  0x8e   : > { %1275 = vmatpush3.msra.mxu0 %v644_v58 }
  0x8f   : > { %1276 = vmatprep.subr.mxu0 %v643_v60 }
  0x90   : > { %1277 = vmatpush3.msra.mxu0 %v643_v60 }
  0x91   : > { %1278 = vmatprep.subr.mxu0 %v642_v62 }
  0x92   : > { %1279 = vmatpush3.msra.mxu0 %v642_v62 }
  0x93   : > { %1280 = vmatprep.subr.mxu0 %v641_v63 }
  0x94   : > { %1281 = vmatpush3.msra.mxu0 %v641_v63 }
  0x95   : > { %1282 = vmatprep.subr.mxu0 %v640_v0 }
  0x96   : > { %1283 = vmatpush3.msra.mxu0 %v640_v0 }
  0x97   : > { %1284 = vmatprep.subr.mxu0 %v639_v1 }
  0x98   : > { %1285 = vmatpush3.msra.mxu0 %v639_v1 }
 0x128   : > { %v1180_v2 = vpop.f32.mrf.mxu0 }
 0x129   : > { %v1199_v3 = vpop.f32.mrf.mxu1 }
 0x12a   : > { %v431_v4 = vpop.f32.mrf.mxu0  ;;  %v518_v6 = vadd.f32 %v1199_v3, %v1180_v2 }
 0x12b   : > { %v512_v5 = vpop.f32.mrf.mxu1 }
 0x12c   : > { %v513_v9 = vadd.f32 %v512_v5, %v431_v4 }
 0x139   : > { %v1218_v7 = vpop.f32.mrf.mxu0 }
 0x13a   : > { %v614_v10 = vadd.f32 %v1218_v7, %v518_v6 }
 0x13b   : > { %v604_v12 = vpop.f32.mrf.mxu0 }
 0x13c   : > { %v623_v13 = vmul.f32 %v1067_v8, %v614_v10  ;;  %v613_v14 = vadd.f32 %v604_v12, %v513_v9 }
 0x13e   : > { %v632_v15 = vadd.f32 %v1068_v11, %v623_v13  ;;  %v622_v16 = vmul.f32 %v1067_v8, %v613_v14 }
 0x140   : > { %v634_v17 = vmax.f32 %v632_v15, 0.0  ;;  %v631_v18 = vadd.f32 %v1068_v11, %v622_v16 }
 0x142   : > { %636 = vst [vmem:[#allocation3 + $0x9] sm:$0xff] %v634_v17  ;;  %v633_v19 = vmax.f32 %v631_v18, 0.0 }
 0x144   : > { %635 = vst [vmem:[#allocation3 + $0x1] sm:$0xff] %v633_v19  ;;  %1251 = vmatprep.mubr.f32.mxu1 %v633_v19 }
 0x145   : > { %1252 = vmatmul.mubr.f32.vlgmr.msra.gmra.mxu1 %v634_v17 }
 0x146   : > { %1290 = vmatpush3.msra.mxu1 %v842_v61 }
 0x147   : > { %1291 = vmatprep.subr.mxu1 %v841_v20 }
 0x148   : > { %1292 = vmatpush3.msra.mxu1 %v841_v20 }
 0x149   : > { %1293 = vmatprep.subr.mxu1 %v840_v21  ;;  %v825_v38 = vld [vmem:[#allocation3 + $0xa] sm:$0xff] }
 0x14a   : > { %1294 = vmatpush3.msra.mxu1 %v840_v21 }
 0x14b   : > { %v637_v24 = vld [vmem:[#allocation3] sm:$0xff]  ;;  %v638_v25 = vld [vmem:[#allocation3 + $0x8] sm:$0xff]  ;;  %1295 = vmatprep.subr.mxu1 %v839_v22 }
 0x14c   : > { %v824_v26 = vld [vmem:[#allocation3 + $0x2] sm:$0xff]  ;;  %1286 = vmatprep.mubr.f32.mxu0 %v637_v24  ;;  %1296 = vmatpush3.msra.mxu1 %v839_v22 }
 0x14d   : > { %1321 = vmatprep.mubr.f32.mxu1 %v824_v26  ;;  %1287 = vmatmul.mubr.f32.vlgmr.msra.gmra.mxu0 %v638_v25 }
 0x14e   : > { %1297 = vmatprep.subr.mxu1 %v838_v23 }
 0x14f   : > { %1298 = vmatpush3.msra.mxu1 %v838_v23 }
 0x150   : > { %1299 = vmatprep.subr.mxu1 %v837_v27 }
 0x151   : > { %1300 = vmatpush3.msra.mxu1 %v837_v27 }
 0x152   : > { %1301 = vmatprep.subr.mxu1 %v836_v28 }
 0x153   : > { %1302 = vmatpush3.msra.mxu1 %v836_v28 }
 0x154   : > { %1303 = vmatprep.subr.mxu1 %v835_v29 }
 0x155   : > { %1304 = vmatpush3.msra.mxu1 %v835_v29 }
 0x156   : > { %1305 = vmatprep.subr.mxu1 %v834_v30 }
 0x157   : > { %1306 = vmatpush3.msra.mxu1 %v834_v30 }
 0x158   : > { %1307 = vmatprep.subr.mxu1 %v833_v31 }
 0x159   : > { %1308 = vmatpush3.msra.mxu1 %v833_v31 }
 0x15a   : > { %1309 = vmatprep.subr.mxu1 %v832_v32 }
 0x15b   : > { %1310 = vmatpush3.msra.mxu1 %v832_v32 }
 0x15c   : > { %1311 = vmatprep.subr.mxu1 %v831_v33 }
 0x15d   : > { %1312 = vmatpush3.msra.mxu1 %v831_v33 }
 0x15e   : > { %1313 = vmatprep.subr.mxu1 %v830_v34 }
 0x15f   : > { %1314 = vmatpush3.msra.mxu1 %v830_v34 }
 0x160   : > { %1315 = vmatprep.subr.mxu1 %v829_v35 }
 0x161   : > { %1316 = vmatpush3.msra.mxu1 %v829_v35 }
 0x162   : > { %1317 = vmatprep.subr.mxu1 %v828_v36 }
 0x163   : > { %1318 = vmatpush3.msra.mxu1 %v828_v36 }
 0x164   : > { %1319 = vmatprep.subr.mxu1 %v827_v37 }
 0x165   : > { %1320 = vmatpush3.msra.mxu1 %v827_v37 }
 0x166   : > { %1322 = vmatmul.mubr.f32.vlgmr.msra.gmra.mxu1 %v825_v38 }
 0x205   : > { %v1253_v39 = vpop.f32.mrf.mxu1 }
 0x207   : > { %v740_v41 = vpop.f32.mrf.mxu1 }
 0x20d   : > { %v1288_v40 = vpop.f32.mrf.mxu0 }
 0x20e   : > { %v821_v43 = vadd.f32 %v1288_v40, %v1253_v39 }
 0x20f   : > { %v815_v42 = vpop.f32.mrf.mxu0 }
 0x210   : > { %v816_v46 = vadd.f32 %v815_v42, %v740_v41 }
 0x226   : > { %v1323_v44 = vpop.f32.mrf.mxu1 }
 0x227   : > { %v919_v47 = vadd.f32 %v1323_v44, %v821_v43 }
 0x228   : > { %v909_v49 = vpop.f32.mrf.mxu1 }
 0x229   : > { %v928_v50 = vmul.f32 %v1069_v45, %v919_v47  ;;  %v918_v51 = vadd.f32 %v909_v49, %v816_v46 }
 0x22b   : > { %v937_v52 = vadd.f32 %v1070_v48, %v928_v50  ;;  %v927_v53 = vmul.f32 %v1069_v45, %v918_v51 }
 0x22d   : > { %v939_v54 = vmax.f32 %v937_v52, 0.0  ;;  %v936_v55 = vadd.f32 %v1070_v48, %v927_v53 }
 0x22f   : > { %941 = vst [vmem:[%s325_s14 + $0x8] sm:$0xff] %v939_v54  ;;  %v938_v56 = vmax.f32 %v936_v55, 0.0 }
 0x231   : > { %940 = vst [vmem:[%s325_s14] sm:$0xff] %v938_v56 }
 0x232   : > { %1489 = shalt.err (!%p1486_p3)
}
 0x233   : > { %s1490_s29 = scalar_lea.hbm %s1779_s30, 256  ;;  %s1494_s13 = scalar_lea.hbm %s1829_s7, 512 }
 0x234   : > { %p1491_p11 = scmp.ne.s32.totalorder %s1779_s30, %s1490_s29  ;;  %p1495_p4 = scmp.lt.s32.totalorder %s1779_s30, %s1829_s7 }
 0x235   : > { %p1496_p6 = scmp.lt.s32.totalorder %s1494_s13, %s1490_s29 }
 0x236   : > { %p1492_p9 = pnand %p1491_p11, %p1850_p2 }
 0x237   : > { %p1497_p8 = por %p1496_p6, %p1495_p4 }
 0x238   : > { %p1493_p1 = pneg %p1492_p9 }
 0x23a   : > { %p1498_p5 = pnand %p1497_p8, %p1493_p1 }
 0x23c   : > { %1501 = shalt.err (!%p1498_p5)
}
 0x23d   : > { %s1553_s15 = smov 128   ;;  %s1554_s10 = smov 8  }
 0x23e   : > { %1334 = dma.vmem_to_hbm [thread:$0]  (%p1850_p2), %s1774_s16, 256, %s1779_s30, %s943_s1, %s1553_s15, %s1553_s15, %s1554_s10  }
 0x23f PF: > { %s971_s9 = sand.u32 1, %s1532_s24   ;;  %p1851_p7 = scmp.ne.s32.totalorder %s1838_s8, 0 }
 0x240   : > { %p1852_p12 = scmp.ge.s32.totalorder %s1544_s27, 2  ;;  %s972_s28 = scalar_lea.sflag [#allocation6], %s971_s9 }
 0x242   : > { %p1348_p13 = pnand %p1852_p12, %p1851_p7 }
 0x244   : > { %p1349_p0 = pneg %p1348_p13 }
 0x246   : > { %1527 = dma.done.wait (%p1349_p0), %s972_s28, 256  }
 0x247   : > { %1529 = vsyncadd (%p1349_p0), %s972_s28, 4294967040  ;;  %p21_p10 = scmp.ge.s32.totalorder %s1673_s23, 4   ;;  %s1853_s24 = smov %s1536_s25 }
 0x248   : > { %s1854_s25 = smov %s1540_s26  ;;  %s1855_s26 = smov %s1689_s12 }
 0x249   : > { %s1856_s27 = smov %s1673_s23  ;;  %23 = sbr.rel (!%p21_p10) target bundleno = 8 (0x8), region = 105 }
 0x24e   :  { %977 = vsyncpa [#allocation5], 1 }
 0x24f   :  { %979 = vsyncpa [#allocation5 + $0x1], 1 }
 0x250   :  { %980 = vsyncpa [#allocation8], 1 }
 0x251   :  { %981 = vsyncpa [#allocation6], 1 }
 0x252   :  { %983 = vsyncpa [#allocation6 + $0x1], 1 }

</bundles_post_ra>
